<compile_context>
chip_gen: v6e
topology: v6e:2x2x1
jax: 0.10.0
libtpu: 0.0.40
codegen_flags: <defaults>
</compile_context>

<pallas_src>
import math

import jax
import jax.numpy as jnp
from jax.experimental import pallas as pl
from jax.experimental.pallas import tpu as pltpu


_DEFAULT_ROW_TILE = 1024


def _fourier_kernel(x_ref, w2_ref, phase_ref, out_ref):
    # x_ref:     (TN, in_features)          VMEM, native x dtype
    # w2_ref:    (in_features, 2*half_out)  VMEM, [2*pi*freqs.T | 2*pi*freqs.T]
    # phase_ref: (1, 2*half_out)            VMEM, [0,...,0, pi/2,...,pi/2]
    # out_ref:   (TN, 2*half_out)           VMEM
    lin = jnp.dot(x_ref[...], w2_ref[...], preferred_element_type=jnp.float32)
    # sin(theta) on the first half, sin(theta + pi/2) == cos(theta) on the
    # second half -> single full-vreg transcendental + single lane-dense store.
    out_ref[...] = jnp.sin(lin + phase_ref[...]).astype(out_ref.dtype)


def _round_up(a, b):
    return ((a + b - 1) // b) * b


def fourier_embedding(x, freqs, *, row_tile=None):
    """Apply random Fourier feature embedding.

    Args:
      x:     (..., in_features) array (any float dtype; output follows it).
      freqs: (half_out, in_features) float array (the fixed "weights").
      row_tile: optional tile size along the flattened row axis
                (rounded up to a multiple of 8). Default 1024 (512-2048 is
                the measured roofline plateau).

    Returns:
      (..., 2 * half_out) array: concat(sin(2*pi*x@freqs.T), cos(...)).
    """
    half_out, in_features = freqs.shape
    out_features = 2 * half_out
    lead_shape = x.shape[:-1]
    n_rows = math.prod(lead_shape) if lead_shape else 1

    x2d = x.reshape(n_rows, in_features)
    compute_dtype = x2d.dtype

    # Fold 2*pi into the tiny constant weight and duplicate it so one matmul
    # yields the full lane-dense (.., 2*half_out) phase block.
    w_t = ((2.0 * math.pi) * jnp.asarray(freqs, jnp.float32)).T  # (in, H)
    w2 = jnp.concatenate([w_t, w_t], axis=1).astype(compute_dtype)  # (in, 2H)
    phase = jnp.concatenate(
        [jnp.zeros((1, half_out), jnp.float32),
         jnp.full((1, half_out), 0.5 * math.pi, jnp.float32)],
        axis=1,
    )

    if row_tile is None:
        row_tile = min(_DEFAULT_ROW_TILE, _round_up(n_rows, 8))
    row_tile = max(8, _round_up(int(row_tile), 8))

    n_padded = _round_up(n_rows, row_tile)
    if n_padded != n_rows:
        x2d = jnp.pad(x2d, ((0, n_padded - n_rows), (0, 0)))
    grid = (n_padded // row_tile,)

    out2d = pl.pallas_call(
        _fourier_kernel,
        out_shape=jax.ShapeDtypeStruct((n_padded, out_features), x.dtype),
        grid_spec=pltpu.PrefetchScalarGridSpec(
            num_scalar_prefetch=0,
            grid=grid,
            in_specs=[
                pl.BlockSpec((row_tile, in_features), lambda i: (i, 0)),
                pl.BlockSpec((in_features, out_features), lambda i: (0, 0)),
                pl.BlockSpec((1, out_features), lambda i: (0, 0)),
            ],
            out_specs=pl.BlockSpec((row_tile, out_features), lambda i: (i, 0)),
        ),
        compiler_params=pltpu.CompilerParams(
            dimension_semantics=("parallel",),
            vmem_limit_bytes=32 * 1024 * 1024,
        ),
    )(x2d, w2, phase)

    if n_padded != n_rows:
        out2d = out2d[:n_rows]
    return out2d.reshape(*lead_shape, out_features)


if __name__ == "__main__":
    # Small shapes consistent with the module's forward:
    #   batch=2, seq=8 leading dims, in_features=8, half_out_features=64, sigma=0.5
    batch, seq = 2, 8
    in_features = 8
    half_out_features = 64
    sigma = 0.5

    key = jax.random.PRNGKey(0)
    k_x, k_f = jax.random.split(key)
    x = jax.random.normal(k_x, (batch, seq, in_features), dtype=jnp.float32)
    # Deterministic "parameter" init matching torch.randn(half_out, in) * sigma
    freqs = jax.random.normal(
        k_f, (half_out_features, in_features), dtype=jnp.float32
    ) * sigma

    out = fourier_embedding(x, freqs)
    out = jax.block_until_ready(out)

    # Pure-JAX reference.
    lin_ref = 2.0 * math.pi * jnp.einsum("oi,...i->...o", freqs, x)
    ref = jnp.concatenate([jnp.sin(lin_ref), jnp.cos(lin_ref)], axis=-1)
    assert out.shape == (batch, seq, 2 * half_out_features)
    assert out.dtype == x.dtype
    assert jnp.allclose(out, ref, atol=3e-5, rtol=1e-5), float(
        jnp.max(jnp.abs(out - ref))
    )

    print("KERNEL_OK")
</pallas_src>

<mosaic_0001>
module attributes {stable_mosaic.version = 11 : i64} {
  func.func @_fourier_kernel(%arg0: i32, %arg1: memref<16x8xf32, #tpu.memory_space<vmem>>, %arg2: memref<8x128xf32, #tpu.memory_space<vmem>>, %arg3: memref<1x128xf32, #tpu.memory_space<vmem>>, %arg4: memref<16x128xf32, #tpu.memory_space<vmem>>) attributes {dimension_semantics = [#tpu.dimension_semantics<parallel>], iteration_bounds = array<i64: 1>, scalar_prefetch = 0 : i64, scratch_operands = 0 : i64, tpu.core_type = #tpu.core_type<tc>, window_params = [{transform_indices = @transform_0, window_bounds = array<i64: 16, 8>}, {pipeline_mode = #tpu.pipeline_mode<synchronous>, transform_indices = @transform_1, window_bounds = array<i64: 8, 128>}, {pipeline_mode = #tpu.pipeline_mode<synchronous>, transform_indices = @transform_2, window_bounds = array<i64: 1, 128>}, {transform_indices = @transform_3, window_bounds = array<i64: 16, 128>}]} {
    %c0 = arith.constant 0 : index
    %c0_0 = arith.constant 0 : index
    %0 = vector.load %arg1[%c0, %c0_0] : memref<16x8xf32, #tpu.memory_space<vmem>>, vector<16x8xf32>
    %c0_1 = arith.constant 0 : index
    %c0_2 = arith.constant 0 : index
    %1 = vector.load %arg2[%c0_1, %c0_2] : memref<8x128xf32, #tpu.memory_space<vmem>>, vector<8x128xf32>
    %cst = arith.constant dense<0.000000e+00> : vector<16x128xf32>
    %2 = tpu.matmul %0, %1, %cst {dimension_numbers = #tpu.dot_dimension_numbers<[1], [0], [0], [1], [0, 0, 1, 1], [], []>} : vector<16x8xf32>, vector<8x128xf32>, vector<16x128xf32> -> vector<16x128xf32>
    %c0_3 = arith.constant 0 : index
    %c0_4 = arith.constant 0 : index
    %3 = vector.load %arg3[%c0_3, %c0_4] : memref<1x128xf32, #tpu.memory_space<vmem>>, vector<1x128xf32>
    %4 = vector.broadcast %3 : vector<1x128xf32> to vector<16x128xf32>
    %5 = arith.addf %2, %4 : vector<16x128xf32>
    %6 = math.sin %5 : vector<16x128xf32>
    %c0_5 = arith.constant 0 : index
    %c0_6 = arith.constant 0 : index
    %7 = vector.load %arg4[%c0_5, %c0_6] : memref<16x128xf32, #tpu.memory_space<vmem>>, vector<16x128xf32>
    tpu.vector_store %arg4[%c0_5, %c0_6], %6 {strides = array<i32>} : memref<16x128xf32, #tpu.memory_space<vmem>>, vector<16x128xf32>,
    return
  }
  func.func @transform_0(%arg0: i32) -> (i32, i32) {
    %c0_i32 = arith.constant 0 : i32
    %c0_i32_0 = arith.constant 0 : i32
    return %arg0, %c0_i32 : i32, i32
  }
  func.func @transform_1(%arg0: i32) -> (i32, i32) {
    %c0_i32 = arith.constant 0 : i32
    %c0_i32_0 = arith.constant 0 : i32
    %c0_i32_1 = arith.constant 0 : i32
    return %c0_i32, %c0_i32_0 : i32, i32
  }
  func.func @transform_2(%arg0: i32) -> (i32, i32) {
    %c0_i32 = arith.constant 0 : i32
    %c0_i32_0 = arith.constant 0 : i32
    %c0_i32_1 = arith.constant 0 : i32
    return %c0_i32, %c0_i32_0 : i32, i32
  }
  func.func @transform_3(%arg0: i32) -> (i32, i32) {
    %c0_i32 = arith.constant 0 : i32
    %c0_i32_0 = arith.constant 0 : i32
    return %arg0, %c0_i32 : i32, i32
  }
}

</mosaic_0001>

<bundles_post_ra>
// kernel: tpu_custom_call.1
= control target key start
LH: loop header
LB: loop body
LE: loop exit
PB: predicated region body
PF: predicated region fallthrough
CT: control target
= control target key end

     0   :  { %vm25_vm0 = vcmask 64512   ;;  %s504_s0 = inlined_call_operand.vmem [shape: f32[16,8], index: 0, kind: input, shape index: {}]   ;;  %s505_s1 = inlined_call_operand.vmem [shape: f32[8,128], index: 1, kind: input, shape index: {}]   ;;  %s506_s2 = inlined_call_operand.vmem [shape: f32[1,128], index: 2, kind: input, shape index: {}]   ;;  %s507_s3 = inlined_call_operand.hbm [shape: f32[16,128], index: 3, kind: output, shape index: {}]  }
   0x1   :  { %v17_v0 = vld [vmem:[%s505_s1] sm:$0xff]  ;;  %v16_v2 = vld [vmem:[%s504_s0 + $0x8] sm:$0xff] }
   0x2   :  { %v15_v1 = vld [vmem:[%s504_s0] sm:$0xff]  ;;  %347 = vmatprep.subr.mxu0 %v17_v0 }
   0x3   :  { %349 = vmatprep.mubr.msk.f32.mxu0 %vm25_vm0, %v15_v1 }
   0x4   :  { %8 = vsyncpa [#allocation3], 0  ;;  %348 = vmatpush3.msra.mxu0 %v17_v0  ;;  %v333_v3 = vld [vmem:[%s506_s2] ss:$0 sm:$0xff]  ;;  %v399_v26 = vmov 683565275  }
   0x5   :  { %350 = vmatmul.mubr.msk.f32.vlgmr.msra.gmra.mxu0 %vm25_vm0, %v16_v2  ;;  %v400_v29 = vmov 2475754826   ;;  %v401_v31 = vmov 2131351028   ;;  %v402_v33 = vmov 2102212464  }
   0x6   :  { %v403_v35 = vmov 920167782   ;;  %v404_v42 = vmov 1326507024   ;;  %s405_s0 = smov [#allocation2]  }
   0x7   :  { %s322_s1 = sshll.u32 %s405_s0, 4  ;;  %s323_s1 = int_to_ptr.vmem [resolvable:$true] %s322_s1 }
   0x8   :  { %s377_s2 = scalar_lea.vmem %s323_s1, 256  ;;  %p382_p1 = scmp.lt.s32.totalorder %s323_s1, %s323_s1 }
   0x9   :  { %p378_p0 = scmp.ne.s32.totalorder %s323_s1, %s377_s2  ;;  %p383_p2 = scmp.lt.s32.totalorder %s377_s2, %s377_s2 }
   0xb   :  { %p384_p3 = por %p383_p2, %p382_p1 }
   0xd   :  { %p385_p4 = pnand %p384_p3, %p378_p0 }
  0xc5   :  { %v351_v4 = vpop.f32.mrf.mxu0 }
  0xc6   :  { %v440_v5 = vadd.f32 %v351_v4, %v333_v3 }
  0xc7   :  { %v98_v6 = vpop.f32.mrf.mxu0 }
  0xc8   :  { %v211_v7 = vand.u32 2147483647, %v440_v5  ;;  %v214_v8 = vand.u32 2139095040, %v440_v5  ;;  %v444_v9 = vadd.f32 %v333_v3, %v98_v6  ;;  %vm213_vm15 = vcmp.lt.s32.totalorder %v440_v5, 0 }
  0xca   :  { %v215_v10 = vshrl.u32 %v214_v8, 23  ;;  %v218_v11 = vand.u32 8388607, %v211_v7  ;;  %v110_v12 = vand.u32 2139095040, %v444_v9  ;;  %v107_v14 = vand.u32 2147483647, %v444_v9 }
  0xcb   :  { %vm212_vm0 = vcmp.le.f32.partialorder %v211_v7, 0.7853982 }
  0xcc   :  { %v340_v13 = vadd.s32 4294967169, %v215_v10  ;;  %v111_v15 = vshrl.u32 %v110_v12, 23  ;;  %v219_v17 = vor.u32 8388608, %v218_v11  ;;  %v114_v19 = vand.u32 8388607, %v107_v14 }
  0xce   :  { %v221_v16 = vadd.s32 1, %v340_v13  ;;  %v336_v18 = vadd.s32 4294967169, %v111_v15  ;;  %v452_v24 = vshll.u32 %v219_v17, 8  ;;  %v115_v28 = vor.u32 8388608, %v114_v19 }
  0xd0   :  { %vm222_vm1 = vcmp.gt.s32.totalorder %v221_v16, 0  ;;  %v117_v21 = vadd.s32 1, %v336_v18  ;;  %v155_v61 = vshll.u32 %v115_v28, 8 }
  0xd1   :  { %v223_v20 = vsel %vm222_vm1, %v221_v16, 0  ;;  %vm109_vm1 = vcmp.lt.s32.totalorder %v444_v9, 0 }
  0xd2   :  { %v224_v22 = vshrl.u32 %v223_v20, 5  ;;  %v225_v23 = vand.u32 31, %v223_v20  ;;  %vm118_vm2 = vcmp.gt.s32.totalorder %v117_v21, 0 }
  0xd3   :  { %v119_v47 = vsel %vm118_vm2, %v117_v21, 0  ;;  %vm108_vm2 = vcmp.le.f32.partialorder %v107_v14, 0.7853982 }
  0xd4   :  { %v226_v25 = vsub.s32 32, %v225_v23  ;;  %v228_v27 = vshll.u32 %v399_v26, %v225_v23  ;;  %v231_v30 = vshll.u32 %v400_v29, %v225_v23  ;;  %v234_v32 = vshll.u32 %v401_v31, %v225_v23 }
  0xd5   :  { %v237_v34 = vshll.u32 %v402_v33, %v225_v23  ;;  %v240_v36 = vshll.u32 %v403_v35, %v225_v23  ;;  %vm243_vm3 = vcmp.lt.s32.totalorder %v224_v22, 1  ;;  %vm245_vm4 = vcmp.lt.s32.totalorder %v224_v22, 3 }
  0xd6   :  { %v229_v37 = vshrl.u32 %v400_v29, %v226_v25  ;;  %v232_v38 = vshrl.u32 %v401_v31, %v226_v25  ;;  %v235_v39 = vshrl.u32 %v402_v33, %v226_v25  ;;  %v227_v40 = vshrl.u32 %v399_v26, %v226_v25 }
  0xd7   :  { %v238_v41 = vshrl.u32 %v403_v35, %v226_v25  ;;  %v241_v43 = vshrl.u32 %v404_v42, %v226_v25  ;;  %vm246_vm5 = vcmp.lt.s32.totalorder %v224_v22, 4  ;;  %v121_v50 = vand.u32 31, %v119_v47 }
  0xd8   :  { %v230_v44 = vor.u32 %v229_v37, %v228_v27  ;;  %v233_v45 = vor.u32 %v232_v38, %v231_v30  ;;  %v236_v46 = vor.u32 %v235_v39, %v234_v32  ;;  %vm244_vm6 = vcmp.lt.s32.totalorder %v224_v22, 2 }
  0xd9   :  { %v239_v48 = vor.u32 %v238_v41, %v237_v34  ;;  %v242_v49 = vor.u32 %v241_v43, %v240_v36  ;;  %v122_v58 = vsub.s32 32, %v121_v50  ;;  %v120_v1 = vshrl.u32 %v119_v47, 5 }
  0xda   :  { %v247_v51 = vsel %vm243_vm3, %v227_v40, %v230_v44  ;;  %v248_v52 = vsel %vm246_vm5, %v236_v46, 2102212464  ;;  %v251_v53 = vsel %vm243_vm3, %v230_v44, %v233_v45  ;;  %v255_v54 = vsel %vm243_vm3, %v233_v45, %v236_v46 }
  0xdb   :  { %v249_v55 = vsel %vm245_vm4, %v233_v45, %v248_v52  ;;  %v252_v56 = vsel %vm246_vm5, %v239_v48, 920167782  ;;  %v256_v57 = vsel %vm246_vm5, %v242_v49, 1326507024  ;;  %v124_v8 = vshll.u32 %v399_v26, %v121_v50 }
  0xdc   :  { %v253_v59 = vsel %vm245_vm4, %v236_v46, %v252_v56  ;;  %v257_v60 = vsel %vm245_vm4, %v239_v48, %v256_v57  ;;  %v250_v62 = vsel %vm244_vm6, %v247_v51, %v249_v55  ;;  %v125_v10 = vshrl.u32 %v400_v29, %v122_v58 }
  0xdd   :  { %v254_v63 = vsel %vm244_vm6, %v251_v53, %v253_v59  ;;  %v258_v0 = vsel %vm244_vm6, %v255_v54, %v257_v60  ;;  %v127_v11 = vshll.u32 %v400_v29, %v121_v50  ;;  %v128_v12 = vshrl.u32 %v401_v31, %v122_v58 }
  0xde   :  { %v464_v2 = vmul.u32.u64.low %v452_v24, %v258_v0  ;;  %v465_v3 = vmul.u32.u64.high %v452_v24, %v258_v0, %v464_v2  ;;  %v468_v4 = vmul.u32.u64.low %v452_v24, %v254_v63  ;;  %v469_v6 = vmul.u32.u64.high %v452_v24, %v254_v63, %v468_v4 }
  0xdf   :  { %v130_v13 = vshll.u32 %v401_v31, %v121_v50  ;;  %v131_v15 = vshrl.u32 %v402_v33, %v122_v58  ;;  %v133_v16 = vshll.u32 %v402_v33, %v121_v50  ;;  %v134_v17 = vshrl.u32 %v403_v35, %v122_v58 }
  0xe0   :  { %v126_v18 = vor.u32 %v125_v10, %v124_v8  ;;  %v129_v19 = vor.u32 %v128_v12, %v127_v11  ;;  %v136_v20 = vshll.u32 %v403_v35, %v121_v50  ;;  %v137_v21 = vshrl.u32 %v404_v42, %v122_v58 }
  0xe1   :  { %v266_v22 = vmul.u32 %v452_v24, %v250_v62  ;;  %vm268_vm7 = vc.u32 %v465_v3, %v468_v4  ;;  %v269_v23 = vadd.s32 1, %v469_v6  ;;  %v132_v25 = vor.u32 %v131_v15, %v130_v13 }
  0xe2   :  { %v123_v27 = vshrl.u32 %v399_v26, %v122_v58  ;;  %v135_v28 = vor.u32 %v134_v17, %v133_v16  ;;  %v138_v29 = vor.u32 %v137_v21, %v136_v20  ;;  %vm139_vm8 = vcmp.lt.s32.totalorder %v120_v1, 1 }
  0xe3   :  { %v270_v30 = vsel %vm268_vm7, %v269_v23, %v469_v6  ;;  %vm141_vm9 = vcmp.lt.s32.totalorder %v120_v1, 3  ;;  %vm142_vm10 = vcmp.lt.s32.totalorder %v120_v1, 4  ;;  %v147_v31 = vsel %vm139_vm8, %v126_v18, %v129_v19 }
  0xe4   :  { %v271_v32 = vadd.s32 %v270_v30, %v266_v22  ;;  %v144_v33 = vsel %vm142_vm10, %v132_v25, 2102212464  ;;  %v148_v34 = vsel %vm142_vm10, %v135_v28, 920167782  ;;  %v151_v24 = vsel %vm139_vm8, %v129_v19, %v132_v25 }
  0xe5   :  { %vm140_vm11 = vcmp.lt.s32.totalorder %v120_v1, 2  ;;  %v143_v35 = vsel %vm139_vm8, %v123_v27, %v126_v18  ;;  %v149_v36 = vsel %vm141_vm9, %v132_v25, %v148_v34  ;;  %v152_v37 = vsel %vm142_vm10, %v138_v29, 1326507024 }
  0xe6   :  { %v272_v38 = vadd.s32 536870912, %v271_v32  ;;  %v145_v39 = vsel %vm141_vm9, %v129_v19, %v144_v33  ;;  %v150_v40 = vsel %vm140_vm11, %v147_v31, %v149_v36  ;;  %v153_v26 = vsel %vm141_vm9, %v135_v28, %v152_v37 }
  0xe7   :  { %v154_v41 = vsel %vm140_vm11, %v151_v24, %v153_v26  ;;  %v479_v42 = vmul.u32.u64.low %v155_v61, %v150_v40  ;;  %v480_v43 = vmul.u32.u64.high %v155_v61, %v150_v40, %v479_v42  ;;  %v146_v47 = vsel %vm140_vm11, %v143_v35, %v145_v39 }
  0xe8   :  { %v273_v44 = vshrl.u32 %v272_v38, 30  ;;  %v482_v45 = vmul.u32.u64.low %v155_v61, %v154_v41  ;;  %v483_v46 = vmul.u32.u64.high %v155_v61, %v154_v41, %v482_v45  ;;  %v162_v51 = vmul.u32 %v155_v61, %v146_v47 }
  0xe9   :  { %v165_v49 = vadd.s32 1, %v480_v43  ;;  %v267_v0 = vadd.s32 %v468_v4, %v465_v3  ;;  %vm303_vm6 = vweird.f32 %v440_v5  ;;  %vm199_vm10 = vweird.f32 %v444_v9 }
  0xea   :  { %v274_v48 = vshll.u32 %v273_v44, 30  ;;  %vm164_vm12 = vc.u32 %v483_v46, %v479_v42  ;;  %v163_v22 = vadd.s32 %v479_v42, %v483_v46  ;;  %v297_v29 = vsub.s32 4, %v273_v44 }
  0xeb   :  { %v166_v52 = vsel %vm164_vm12, %v165_v49, %v480_v43 }
  0xec   :  { %v275_v50 = vsub.s32 %v271_v32, %v274_v48  ;;  %v167_v54 = vadd.s32 %v166_v52, %v162_v51  ;;  %v298_v24 = vsel %vm213_vm15, %v297_v29, %v273_v44 }
  0xed   :  { %v300_v37 = vsel %vm212_vm0, 0, %v298_v24 }
  0xee   :  { %v277_v53 = vsub.s32 0, %v275_v50  ;;  %v168_v56 = vadd.s32 536870912, %v167_v54  ;;  %v304_v40 = vadd.s32 3, %v300_v37 }
  0xf0   :  { %v341_v55 = vmin.u32 %v277_v53, %v275_v50  ;;  %v169_v58 = vshrl.u32 %v168_v56, 30  ;;  %v305_v43 = vand.u32 3, %v304_v40 }
  0xf2   :  { %v279_v57 = vclz %v341_v55  ;;  %v170_v60 = vshll.u32 %v169_v58, 30  ;;  %v193_v26 = vsub.s32 4, %v169_v58  ;;  %vm310_vm3 = vcmp.eq.s32.totalorder %v305_v43, 2 }
  0xf3   :  { %vm307_vm4 = vcmp.eq.s32.totalorder %v305_v43, 0  ;;  %vm306_vm5 = vcmp.lt.s32.totalorder %v305_v43, 2 }
  0xf4   :  { %v342_v59 = vadd.s32 4294967294, %v279_v57  ;;  %v171_v62 = vsub.s32 %v167_v54, %v170_v60  ;;  %v194_v42 = vsel %vm109_vm1, %v193_v26, %v169_v58 }
  0xf5   :  { %v196_v46 = vsel %vm108_vm2, 0, %v194_v42 }
  0xf6   :  { %vm343_vm13 = vcmp.lt.s32.totalorder %v342_v59, 0  ;;  %v173_v2 = vsub.s32 0, %v171_v62 }
  0xf7   :  { %v282_v63 = vsel %vm343_vm13, 0, %v342_v59 }
  0xf8   :  { %v283_v1 = vsub.s32 32, %v282_v63  ;;  %v287_v61 = vsub.s32 4294967266, %v282_v63  ;;  %v284_v6 = vshll.u32 %v275_v50, %v282_v63  ;;  %v337_v11 = vmin.u32 %v173_v2, %v171_v62 }
  0xf9   :  { %v200_v50 = vadd.s32 3, %v196_v46 }
  0xfa   :  { %v285_v8 = vshrl.u32 %v267_v0, %v283_v1  ;;  %v288_v10 = vadd.s32 127, %v287_v61  ;;  %v175_v15 = vclz %v337_v11 }
  0xfb   :  { %v201_v53 = vand.u32 3, %v200_v50 }
  0xfc   :  { %v286_v12 = vor.u32 %v285_v8, %v284_v6  ;;  %v289_v13 = vshll.u32 %v288_v10, 23  ;;  %v338_v17 = vadd.s32 4294967294, %v175_v15 }
  0xfd   :  { %vm206_vm7 = vcmp.eq.s32.totalorder %v201_v53, 2  ;;  %vm203_vm8 = vcmp.eq.s32.totalorder %v201_v53, 0  ;;  %vm202_vm9 = vcmp.lt.s32.totalorder %v201_v53, 2 }
  0xfe   :  { %v290_v16 = vor.u32 4788187, %v289_v13  ;;  %v293_v19 = vcvt.s32.f32 %v286_v12  ;;  %vm339_vm14 = vcmp.lt.s32.totalorder %v338_v17, 0 }
  0xff   :  { %v178_v20 = vsel %vm339_vm14, 0, %v338_v17 }
 0x100   :  { %v291_v18 = vand.u32 2147483647, %v290_v16  ;;  %v179_v3 = vsub.s32 32, %v178_v20  ;;  %v183_v4 = vsub.s32 4294967266, %v178_v20  ;;  %v180_v25 = vshll.u32 %v171_v62, %v178_v20 }
 0x102   :  { %v294_v21 = vmul.f32 %v293_v19, %v291_v18  ;;  %v181_v27 = vshrl.u32 %v163_v22, %v179_v3  ;;  %v184_v28 = vadd.s32 127, %v183_v4 }
 0x104   :  { %v295_v23 = vxor.u32 2147483648, %v294_v21  ;;  %v182_v31 = vor.u32 %v181_v27, %v180_v25  ;;  %v185_v32 = vshll.u32 %v184_v28, 23 }
 0x106   :  { %v296_v30 = vsel %vm213_vm15, %v295_v23, %v294_v21  ;;  %v186_v34 = vor.u32 4788187, %v185_v32  ;;  %v189_v36 = vcvt.s32.f32 %v182_v31 }
 0x107   :  { %v299_v33 = vsel %vm212_vm0, %v440_v5, %v296_v30 }
 0x108   :  { %369 = vcosq.f32 %v299_v33  ;;  %v187_v35 = vand.u32 2147483647, %v186_v34 }
 0x109   :  { %371 = vsinq.f32 %v299_v33 }
 0x10a   :  { %v190_v38 = vmul.f32 %v189_v36, %v187_v35 }
 0x10c   :  { %v191_v39 = vxor.u32 2147483648, %v190_v38 }
 0x10e   :  { %v192_v7 = vsel %vm109_vm1, %v191_v39, %v190_v38 }
 0x10f   :  { %v195_v41 = vsel %vm108_vm2, %v444_v9, %v192_v7 }
 0x110   :  { %373 = vcosq.f32 %v195_v41 }
 0x111   :  { %375 = vsinq.f32 %v195_v41 }
 0x115   :  { %v370_v44 = vpop.eup %369 }
 0x116   :  { %v372_v45 = vpop.eup %371  ;;  %v311_v47 = vxor.u32 2147483648, %v370_v44 }
 0x117   :  { %v308_v48 = vxor.u32 2147483648, %v372_v45 }
 0x118   :  { %v312_v49 = vsel %vm310_vm3, %v311_v47, %v372_v45 }
 0x119   :  { %v309_v51 = vsel %vm307_vm4, %v370_v44, %v308_v48 }
 0x11a   :  { %v313_v14 = vsel %vm306_vm5, %v309_v51, %v312_v49 }
 0x11b   :  { %v314_v52 = vsel %vm303_vm6, nan, %v313_v14 }
 0x11c   :  { %316 = vst [vmem:[#allocation2 + $0x8] sm:$0xff] %v314_v52 }
 0x11d   :  { %v374_v54 = vpop.eup %373 }
 0x11e   :  { %v376_v55 = vpop.eup %375  ;;  %v207_v56 = vxor.u32 2147483648, %v374_v54 }
 0x11f   :  { %v204_v57 = vxor.u32 2147483648, %v376_v55 }
 0x120   :  { %v208_v58 = vsel %vm206_vm7, %v207_v56, %v376_v55 }
 0x121   :  { %v205_v59 = vsel %vm203_vm8, %v374_v54, %v204_v57 }
 0x122   :  { %v209_v60 = vsel %vm202_vm9, %v205_v59, %v208_v58 }
 0x123   :  { %v210_v5 = vsel %vm199_vm10, nan, %v209_v60 }
 0x124   :  { %315 = vst [vmem:[#allocation2] sm:$0xff] %v210_v5 }
 0x125   :  { %388 = shalt.err (!%p385_p4)
}
 0x126   :  { %s406_s20 = smov 128   ;;  %s407_s21 = smov 8  }
 0x127   :  { %328 = dma.vmem_to_hbm [thread:$0]  %s323_s1, 256, %s507_s3, [#allocation3], %s406_s20, %s406_s20, %s407_s21  }
 0x128   :  { %397 = dma.done.wait [#allocation3], 256  }
 0x129   :  { %398 = vsyncadd [#allocation3], 4294967040 }
 0x12a   :  { %332 = vsyncpa [#allocation3], 1 }

</bundles_post_ra>
